<compile_context>
chip_gen: v7x
topology: tpu7x:2x2x1
jax: 0.10.0
libtpu: 0.0.40
codegen_flags: <defaults>
</compile_context>

<pallas_src>
import jax
import jax.numpy as jnp
from jax import lax
from jax.experimental import pallas as pl
from jax.experimental.pallas import tpu as pltpu


def _zero_conv_kernel(x_ref, halo_ref, w_ref, b_ref, o_ref):
    # x_ref:    (1, C_in, TL)      current L-tile of the input (NCL layout)
    # halo_ref: (1, nt, C_in, 2)   per-batch resident: [left,right] halo column
    #                              for every tile (value 1.0 at sequence ends)
    # w_ref:    (C_out, 3*C_in)    exp(3*scale)-folded weights, col = k*C_in+ci
    # b_ref:    (C_out, 1)         exp(3*scale)-folded bias
    # o_ref:    (1, C_out, TL)
    j = pl.program_id(1)
    C_in, TL = x_ref.shape[1], x_ref.shape[2]

    # In-kernel sub-chunk width: bounds vreg pressure while the tile (and its
    # DMA) can be arbitrarily large.
    if TL % 512 == 0:
        CH = 512
    elif TL % 256 == 0:
        CH = 256
    elif TL % 128 == 0:
        CH = 128
    else:
        CH = TL
    n_chunks = TL // CH

    w = w_ref[...].astype(jnp.float32)            # (C_out, 3*C_in)
    b = b_ref[...].astype(jnp.float32)            # (C_out, 1)

    # This tile's halo pair from the per-batch resident block (leading-dim
    # dynamic slice only; C_in stays on the sublane axis).
    pair = halo_ref[0, pl.ds(j, 1), :, :]          # (1, C_in, 2)
    halo_l = pair[0, :, 0:1].astype(jnp.float32)   # column at l = j*TL - 1 (or pad 1.0)
    halo_r = pair[0, :, 1:2].astype(jnp.float32)   # column at l = (j+1)*TL   (or pad 1.0)

    # Lane masks for patching the wrapped-around column after the roll
    # (hoisted out of the chunk loop).
    lane = lax.broadcasted_iota(jnp.int32, (C_in, CH), 1)
    first_lane = lane == 0
    last_lane = lane == CH - 1

    def compute(xc, left_col, right_col):
        # Taps at l-1 / l / l+1: one XLU rotate + one VPU select per plane.
        x_lm1 = jnp.where(first_lane, left_col, pltpu.roll(xc, shift=1, axis=1))
        x_lp1 = jnp.where(last_lane, right_col, pltpu.roll(xc, shift=CH - 1, axis=1))
        taps = jnp.concatenate([x_lm1, xc, x_lp1], axis=0)      # (3*C_in, CH)
        # Contraction on the MXU; bias already carries the exp(3*scale) gain.
        return jnp.dot(w, taps, preferred_element_type=jnp.float32) + b

    if n_chunks <= 4:
        # Static unroll: all slice starts are compile-time constants.
        left_col = halo_l
        for c in range(n_chunks):
            s = c * CH
            xc = x_ref[0, :, s:s + CH].astype(jnp.float32)       # (C_in, CH)
            if c + 1 < n_chunks:
                right_col = x_ref[0, :, s + CH:s + CH + 1].astype(jnp.float32)
            else:
                right_col = halo_r
            o_ref[0, :, s:s + CH] = compute(xc, left_col, right_col).astype(o_ref.dtype)
            left_col = xc[:, CH - 1:CH]
    else:
        def body(c, left_col):
            s = pl.multiple_of(c * CH, CH)
            xc = x_ref[0, :, pl.ds(s, CH)].astype(jnp.float32)   # (C_in, CH)
            is_last = c == n_chunks - 1
            # First column of the next chunk (aligned CH-wide load, static
            # [:, :1] slice); the load start is clamped in-bounds for the last
            # chunk whose value is replaced by the tile's right halo anyway.
            ns = pl.multiple_of(jnp.where(is_last, 0, (c + 1) * CH), CH)
            nxt = x_ref[0, :, pl.ds(ns, CH)]
            right_col = jnp.where(is_last, halo_r, nxt[:, 0:1].astype(jnp.float32))
            o_ref[0, :, pl.ds(s, CH)] = compute(xc, left_col, right_col).astype(o_ref.dtype)
            return xc[:, CH - 1:CH]                              # carry: left halo of next chunk
        lax.fori_loop(0, n_chunks, body, halo_l, unroll=2)


def _pick_l_tile(l_pad, c_in, c_out, max_tile, batch):
    """Largest 128-aligned tile dividing l_pad within a double-buffered IO budget."""
    cin_p, cout_p = max(8, c_in), max(8, c_out)
    budget = 12 << 20                                  # per-step x+out, double-buffered
    lane_cap = max(128, budget // (8 * (cin_p + cout_p)))
    cap = min(max_tile, lane_cap, l_pad)
    m = l_pad // 128

    def largest_tile(d_cap):
        d = max(1, min(m, d_cap))
        while m % d:
            d -= 1
        return 128 * d

    tl = largest_tile(cap // 128)
    # v7x has 2 TensorCores: guarantee >= 2 parallel grid steps when N == 1.
    if batch == 1 and l_pad // tl == 1 and m >= 2:
        tl = largest_tile(m // 2)
    return tl


def zero_conv(x_ncl, weight, bias, scale, *, max_tile=32768):
    """ZeroConv forward.

    x_ncl:  (N, C_in, L)       PyTorch NCL layout (kept end-to-end)
    weight: (C_out, C_in, 3)   PyTorch Conv1d weight layout
    bias:   (C_out,)
    scale:  (1, C_out, 1)
    returns (N, C_out, L)
    """
    N, C_in, L = x_ncl.shape
    C_out = weight.shape[0]

    # Fold exp(3*scale) into the conv parameters (exact):
    #   (conv(x, w) + b) * e  ==  conv(x, w*e) + b*e
    gain = jnp.exp(3.0 * scale.reshape(C_out).astype(jnp.float32))       # (C_out,)
    w_f = weight.astype(jnp.float32) * gain[:, None, None]               # (C_out,C_in,3)
    b_f = bias.astype(jnp.float32) * gain                                # (C_out,)
    w2 = jnp.transpose(w_f, (0, 2, 1)).reshape(C_out, 3 * C_in)          # col = k*C_in+ci
    b2 = b_f.reshape(C_out, 1)

    # Pad L to a lane multiple; the first padded column is 1.0, i.e. exactly
    # the right-hand F.pad column needed by output l = L-1.  Extra outputs in
    # the padded region are sliced off below.
    L_pad = ((L + 127) // 128) * 128
    x_p = x_ncl
    if L_pad != L:
        x_p = jnp.pad(x_ncl, ((0, 0), (0, 0), (0, L_pad - L)), constant_values=1.0)

    TL = _pick_l_tile(L_pad, C_in, C_out, max_tile, N)
    nt = L_pad // TL

    # Per-batch resident halo block: halo[n, j, :, 0] = column left of tile j,
    # halo[n, j, :, 1] = column right of tile j; value 1.0 at sequence ends
    # (this *is* F.pad(input, [1, 1], value=1)).
    ones_col = jnp.ones((N, C_in, 1), x_p.dtype)
    if nt > 1:
        lcols = jnp.concatenate([ones_col, x_p[:, :, TL - 1:L_pad - 1:TL]], axis=2)
        rcols = jnp.concatenate([x_p[:, :, TL::TL], ones_col], axis=2)
    else:
        lcols = ones_col
        rcols = ones_col
    halo = jnp.transpose(jnp.stack([lcols, rcols], axis=-1), (0, 2, 1, 3))  # (N,nt,C_in,2)

    # Explicit VMEM budget: double-buffered x/out tiles + resident halo block,
    # clamped to <= 32 MiB so tiles tuned on 128 MiB parts also fit v7x.
    cin_p, cout_p = max(8, C_in), max(8, C_out)
    io_bytes = 4 * (cin_p + cout_p) * TL
    halo_bytes = nt * 8 * 128 * 4
    vmem_limit = int(min(max(4 * io_bytes + 4 * halo_bytes + (2 << 20), 16 << 20), 32 << 20))

    out = pl.pallas_call(
        _zero_conv_kernel,
        out_shape=jax.ShapeDtypeStruct((N, C_out, L_pad), x_ncl.dtype),
        grid_spec=pltpu.PrefetchScalarGridSpec(
            num_scalar_prefetch=0,
            grid=(N, nt),
            in_specs=[
                pl.BlockSpec((1, C_in, TL), lambda n, j: (n, 0, j)),
                pl.BlockSpec((1, nt, C_in, 2), lambda n, j: (n, 0, 0, 0)),
                pl.BlockSpec((C_out, 3 * C_in), lambda n, j: (0, 0)),
                pl.BlockSpec((C_out, 1), lambda n, j: (0, 0)),
            ],
            out_specs=pl.BlockSpec((1, C_out, TL), lambda n, j: (n, 0, j)),
        ),
        compiler_params=pltpu.CompilerParams(
            dimension_semantics=("parallel", "parallel"),
            vmem_limit_bytes=vmem_limit,
        ),
    )(x_p, halo, w2, b2)

    if L_pad != L:
        out = out[:, :, :L]
    return out


def zero_conv_reference(x_ncl, weight, bias, scale):
    """Pure-JAX reference matching the PyTorch forward exactly."""
    L = x_ncl.shape[-1]
    x_pad = jnp.pad(x_ncl, ((0, 0), (0, 0), (1, 1)), constant_values=1.0)
    taps = jnp.stack([x_pad[:, :, k:k + L] for k in range(3)], axis=-1)  # (N,Cin,L,3)
    out = jnp.einsum('nilk,oik->nol', taps, weight, precision='highest')
    out = out + bias[None, :, None]
    return out * jnp.exp(scale * 3.0)


if __name__ == "__main__":
    key = jax.random.PRNGKey(0)
    fn = jax.jit(zero_conv, static_argnames=("max_tile",))

    def run_case(N, C_in, C_out, L, max_tile=32768):
        kx, kw, kb, ks = jax.random.split(jax.random.fold_in(key, L), 4)
        x = jax.random.normal(kx, (N, C_in, L), dtype=jnp.float32)
        # Parameter shapes from __init__: weight (C_out, C_in, 3), bias
        # (C_out,), scale (1, C_out, 1) — deterministic nonzero values.
        weight = 0.1 * jax.random.normal(kw, (C_out, C_in, 3), dtype=jnp.float32)
        bias = 0.1 * jax.random.normal(kb, (C_out,), dtype=jnp.float32)
        scale = 0.1 * jax.random.normal(ks, (1, C_out, 1), dtype=jnp.float32)

        out = jax.block_until_ready(fn(x, weight, bias, scale, max_tile=max_tile))
        ref = zero_conv_reference(x, weight, bias, scale)
        assert out.shape == (N, C_out, L), out.shape
        # Tolerance is loose only to stay robust to MXU f32 pass rounding
        # differences across TPU generations; structural errors are O(0.1+).
        err = float(jnp.max(jnp.abs(out - ref)))
        assert bool(jnp.allclose(out, ref, atol=5e-3, rtol=5e-3)), err

    # Module-sized small case (ragged L -> padded to one 128-lane tile).
    run_case(N=2, C_in=4, C_out=8, L=16)
    # Ragged L exercising pad-to-128 + output slice.
    run_case(N=2, C_in=4, C_out=8, L=200)
    # Multi-tile case: L tiling + per-batch resident halo block (TL=128, nt=2).
    run_case(N=2, C_in=4, C_out=8, L=256, max_tile=128)
    # Single tile, two static in-kernel sub-chunks (carry across chunks).
    run_case(N=2, C_in=4, C_out=8, L=1024)
    # Single tile, eight sub-chunks -> lax.fori_loop streaming path.
    run_case(N=2, C_in=4, C_out=8, L=4096)

    print("KERNEL_OK")
</pallas_src>

<mosaic_0001>
module attributes {stable_mosaic.version = 11 : i64} {
  func.func @_zero_conv_kernel(%arg0: i32, %arg1: i32, %arg2: memref<1x4x128xf32, #tpu.memory_space<vmem>>, %arg3: memref<1x1x4x2xf32, #tpu.memory_space<vmem>>, %arg4: memref<8x12xf32, #tpu.memory_space<vmem>>, %arg5: memref<8x1xf32, #tpu.memory_space<vmem>>, %arg6: memref<1x8x128xf32, #tpu.memory_space<vmem>>) attributes {dimension_semantics = [#tpu.dimension_semantics<parallel>, #tpu.dimension_semantics<parallel>], iteration_bounds = array<i64: 2, 1>, scalar_prefetch = 0 : i64, scratch_operands = 0 : i64, tpu.core_type = #tpu.core_type<tc>, window_params = [{transform_indices = @transform_0, window_bounds = array<i64: 1, 4, 128>}, {transform_indices = @transform_1, window_bounds = array<i64: 1, 1, 4, 2>}, {pipeline_mode = #tpu.pipeline_mode<synchronous>, transform_indices = @transform_2, window_bounds = array<i64: 8, 12>}, {pipeline_mode = #tpu.pipeline_mode<synchronous>, transform_indices = @transform_3, window_bounds = array<i64: 8, 1>}, {transform_indices = @transform_4, window_bounds = array<i64: 1, 8, 128>}]} {
    %c0 = arith.constant 0 : index
    %c0_0 = arith.constant 0 : index
    %0 = vector.load %arg4[%c0, %c0_0] : memref<8x12xf32, #tpu.memory_space<vmem>>, vector<8x12xf32>
    %c0_1 = arith.constant 0 : index
    %c0_2 = arith.constant 0 : index
    %1 = vector.load %arg5[%c0_1, %c0_2] : memref<8x1xf32, #tpu.memory_space<vmem>>, vector<8x1xf32>
    %c0_3 = arith.constant 0 : index
    %2 = arith.index_cast %arg1 : i32 to index
    %c0_4 = arith.constant 0 : index
    %c0_5 = arith.constant 0 : index
    %3 = vector.load %arg3[%c0_3, %2, %c0_4, %c0_5] : memref<1x1x4x2xf32, #tpu.memory_space<vmem>>, vector<1x1x4x2xf32>
    %4 = vector.shape_cast %3 : vector<1x1x4x2xf32> to vector<1x4x2xf32>
    %5 = vector.extract_strided_slice %4 {offsets = [0, 0, 0], sizes = [1, 4, 1], strides = [1, 1, 1]} : vector<1x4x2xf32> to vector<1x4x1xf32>
    %6 = vector.shape_cast %5 : vector<1x4x1xf32> to vector<4x1xf32>
    %7 = vector.extract_strided_slice %4 {offsets = [0, 0, 1], sizes = [1, 4, 1], strides = [1, 1, 1]} : vector<1x4x2xf32> to vector<1x4x1xf32>
    %8 = vector.shape_cast %7 : vector<1x4x1xf32> to vector<4x1xf32>
    %9 = tpu.iota {dimensions = array<i32: 1>} : vector<4x128xi32>
    %c0_i32 = arith.constant 0 : i32
    %10 = vector.broadcast %c0_i32 : i32 to vector<4x128xi32>
    %11 = arith.cmpi eq, %9, %10 : vector<4x128xi32>
    %c127_i32 = arith.constant 127 : i32
    %12 = vector.broadcast %c127_i32 : i32 to vector<4x128xi32>
    %13 = arith.cmpi eq, %9, %12 : vector<4x128xi32>
    %c0_6 = arith.constant 0 : index
    %c0_7 = arith.constant 0 : index
    %c0_8 = arith.constant 0 : index
    %14 = vector.load %arg2[%c0_6, %c0_7, %c0_8] : memref<1x4x128xf32, #tpu.memory_space<vmem>>, vector<1x4x128xf32>
    %15 = vector.shape_cast %14 : vector<1x4x128xf32> to vector<4x128xf32>
    %c1_i32 = arith.constant 1 : i32
    %16 = tpu.dynamic_rotate %15 by %c1_i32 dim 1 : vector<4x128xf32>, i32 -> vector<4x128xf32>
    %17 = vector.shape_cast %6 : vector<4x1xf32> to vector<4x1xf32>
    %18 = vector.broadcast %17 : vector<4x1xf32> to vector<4x128xf32>
    %19 = arith.select %11, %18, %16 : vector<4x128xi1>, vector<4x128xf32>
    %c127_i32_9 = arith.constant 127 : i32
    %20 = tpu.dynamic_rotate %15 by %c127_i32_9 dim 1 : vector<4x128xf32>, i32 -> vector<4x128xf32>
    %21 = vector.shape_cast %8 : vector<4x1xf32> to vector<4x1xf32>
    %22 = vector.broadcast %21 : vector<4x1xf32> to vector<4x128xf32>
    %23 = arith.select %13, %22, %20 : vector<4x128xi1>, vector<4x128xf32>
    %24 = tpu.concatenate %19, %15, %23 in 0 : vector<4x128xf32>, vector<4x128xf32>, vector<4x128xf32> -> vector<12x128xf32>
    %cst = arith.constant dense<0.000000e+00> : vector<8x128xf32>
    %25 = tpu.matmul %0, %24, %cst {dimension_numbers = #tpu.dot_dimension_numbers<[1], [0], [0], [1], [0, 0, 1, 1], [], []>} : vector<8x12xf32>, vector<12x128xf32>, vector<8x128xf32> -> vector<8x128xf32>
    %26 = vector.broadcast %1 : vector<8x1xf32> to vector<8x128xf32>
    %27 = arith.addf %25, %26 : vector<8x128xf32>
    %c0_10 = arith.constant 0 : index
    %c0_11 = arith.constant 0 : index
    %c0_12 = arith.constant 0 : index
    %28 = vector.load %arg6[%c0_10, %c0_11, %c0_12] : memref<1x8x128xf32, #tpu.memory_space<vmem>>, vector<1x8x128xf32>
    %29 = vector.shape_cast %28 : vector<1x8x128xf32> to vector<8x128xf32>
    %30 = vector.shape_cast %27 : vector<8x128xf32> to vector<1x8x128xf32>
    tpu.vector_store %arg6[%c0_10, %c0_11, %c0_12], %30 {strides = array<i32>} : memref<1x8x128xf32, #tpu.memory_space<vmem>>, vector<1x8x128xf32>,
    return
  }
  func.func @transform_0(%arg0: i32, %arg1: i32) -> (i32, i32, i32) {
    %c0_i32 = arith.constant 0 : i32
    %c0_i32_0 = arith.constant 0 : i32
    return %arg0, %c0_i32, %arg1 : i32, i32, i32
  }
  func.func @transform_1(%arg0: i32, %arg1: i32) -> (i32, i32, i32, i32) {
    %c0_i32 = arith.constant 0 : i32
    %c0_i32_0 = arith.constant 0 : i32
    %c0_i32_1 = arith.constant 0 : i32
    %c0_i32_2 = arith.constant 0 : i32
    return %arg0, %c0_i32, %c0_i32_0, %c0_i32_1 : i32, i32, i32, i32
  }
  func.func @transform_2(%arg0: i32, %arg1: i32) -> (i32, i32) {
    %c0_i32 = arith.constant 0 : i32
    %c0_i32_0 = arith.constant 0 : i32
    %c0_i32_1 = arith.constant 0 : i32
    return %c0_i32, %c0_i32_0 : i32, i32
  }
  func.func @transform_3(%arg0: i32, %arg1: i32) -> (i32, i32) {
    %c0_i32 = arith.constant 0 : i32
    %c0_i32_0 = arith.constant 0 : i32
    %c0_i32_1 = arith.constant 0 : i32
    return %c0_i32, %c0_i32_0 : i32, i32
  }
  func.func @transform_4(%arg0: i32, %arg1: i32) -> (i32, i32, i32) {
    %c0_i32 = arith.constant 0 : i32
    %c0_i32_0 = arith.constant 0 : i32
    return %arg0, %c0_i32, %arg1 : i32, i32, i32
  }
}

</mosaic_0001>

<bundles_post_ra>
// kernel: zero_conv.1
= control target key start
LH: loop header
LB: loop body
LE: loop exit
PB: predicated region body
PF: predicated region fallthrough
CT: control target
= control target key end

     0   :  { %9 = vsyncpa [#allocation3], 0  ;;  %s778_s0 = inlined_call_operand.vmem [shape: f32[2,4,128], index: 0, kind: input, shape index: {}]   ;;  %s779_s1 = inlined_call_operand.vmem [shape: f32[2,1,4,2], index: 1, kind: input, shape index: {}]   ;;  %s780_s2 = inlined_call_operand.vmem [shape: f32[8,12], index: 2, kind: input, shape index: {}]   ;;  %s781_s3 = inlined_call_operand.vmem [shape: f32[8,1], index: 3, kind: input, shape index: {}]   ;;  %s782_s4 = inlined_call_operand.hbm [shape: f32[2,8,128], index: 4, kind: output, shape index: {}]  }
   0x1   :  { %11 = vsyncpa [#allocation3 + $0x1], 0  ;;  %s657_s15 = smov 0   ;;  %s659_s16 = smov 0  }
   0x2   :  { %s661_s17 = smov 0   ;;  %s663_s18 = smov 0  }
   0x3   :  { %s665_s19 = smov 0   ;;  %s667_s20 = smov 0  }
   0x4 LB: > { %s448_s21 = sadd.s32 4294967295, %s621_s20   ;;  %s449_s22 = sadd.s32 4294967294, %s621_s20   ;;  %s621_s20 = sphi %s667_s20, %s17_s20   ;;  %s617_s19 = sphi %s665_s19, %s789_s19   ;;  %s613_s18 = sphi %s663_s18, %s788_s18   ;;  %s609_s17 = sphi %s661_s17, %s787_s17   ;;  %s605_s16 = sphi %s659_s16, %s786_s16   ;;  %s601_s15 = sphi %s657_s15, %s785_s15  }
   0x5   : > { %s29_s23 = sadd.s32 1, %s617_s19  ;;  %s134_s24 = sadd.s32 1, %s609_s17 }
   0x6   : > { %p31_p0 = scmp.ge.s32.totalorder %s29_s23, 2  ;;  %p144_p1 = scmp.ne.s32.totalorder %s609_s17, %s605_s16 }
   0x7   : > { %p145_p2 = scmp.eq.s32.totalorder %s448_s21, 1  ;;  %p150_p3 = scmp.ne.s32.totalorder %s605_s16, %s601_s15 }
   0x8   : > { %s791_s23 = smov (%p31_p0, %s29_s23), 0  ;;  %p151_p5 = scmp.eq.s32.totalorder %s449_s22, 1 }
   0x9   : > { %p697_p4 = por %p145_p2, %p144_p1  ;;  %s129_s26 = ssub.s32 %s617_s19, %s791_s23 }
   0xa   : > { %p452_p6 = scmp.ge.s32.totalorder %s621_s20, 1  ;;  %p132_p7 = scmp.eq.s32.totalorder %s129_s26, 0 }
   0xb   : > { %p704_p8 = por %p151_p5, %p150_p3  ;;  %p192_p9 = scmp.lt.s32.totalorder %s621_s20, 3 }
   0xc   : > { %s710_s28 = scalar_select %p132_p7, %s609_s17, %s134_s24  }
   0xd   : > { %p193_p10 = pnand %p452_p6, %p192_p9 }
   0xe   : > { %p224_p11 = scmp.lt.s32.totalorder (!%p193_p10), %s613_s18, 1  ;;  %v623_v0 = vmov (!%p193_p10), 0   ;;  %s624_s11 = smov (!%p193_p10), 1   ;;  %v625_v3 = vmov (!%p193_p10), 1   ;;  %v627_v4 = vmov (!%p193_p10), 0.0|0.0   ;;  %vm628_vm0 = vmmov (!%p193_p10), 0  }
   0xf   : > { %196 = sbr.rel (%p193_p10) target bundleno = 394 (0x18a), region = 36  ;;  %539 = vset.pattern.permute.xlu0 (!%p193_p10), %v623_v0  ;;  %541 = vset.pattern.permute.xlu1 (!%p193_p10), %v623_v0  ;;  %s626_s12 = smov (!%p193_p10), 127   ;;  %v629_v5 = vmov (!%p193_p10), 0.0   ;;  %v236_v6 = vld [vmem:[%s781_s3] sm:$0xff] (!%p193_p10)  ;;  %v240_v7 = vlaneseq (!%p193_p10)  ;;  %vm263_vm3 = vcmask (!%p193_p10), 1043456   ;;  %vm630_vm4 = vmmov (!%p193_p10), 1  }
  0x10   : > { %472 = vmatprep.subr.bf16.mxu0 (!%p193_p10), %v627_v4  ;;  %469 = vmatprep.mubr.msk.f32.mxu0 (!%p193_p10), %vm628_vm0, %v629_v5  ;;  %vm474_vm5 = vmpackc.low (!%p193_p10), %vm263_vm3, %vm630_vm4  ;;  %v235_v18 = vld [vmem:[%s780_s2] sm:$0xff] (!%p193_p10)  ;;  %vm270_vm6 = vcmask (!%p193_p10), 97280   ;;  %s221_s24 = sand.u32 (!%p193_p10), 1, %s605_s16  }
  0x11   : > { %v241_v8 = vand.u32 (!%p193_p10), 127, %v240_v7  ;;  %s453_s26 = sshll.u32 (!%p193_p10), %s221_s24, 3  ;;  %s349_s9 = scalar_lea.sflag (!%p193_p10), [#allocation3], %s221_s24 }
  0x13   : > { %vm242_vm1 = vcmp.eq.s32.totalorder (!%p193_p10), %v241_v8, 0  ;;  %vm243_vm2 = vcmp.eq.s32.totalorder (!%p193_p10), %v241_v8, 127 }
  0x16   : > { %s225_s29 = scalar_select %p224_p11, %s613_s18, 1 }
  0x18   : > { %s454_s30 = sshll.u32 %s225_s29, 2  ;;  %s459_s29 = sshll.u32 %s613_s18, 7 }
  0x19   : > { %s234_s7 = scalar_lea.vmem %s779_s1, %s454_s30  ;;  %s230_s10 = scalar_lea.vmem %s778_s0, %s454_s30 }
  0x1a   : > { %v239_v1 = vld [vmem:[%s234_s7] sm:$0xf]  ;;  %s223_s30 = scalar_lea.vmem [#allocation2], %s453_s26  ;;  %s731_s8 = scalar_lea.hbm %s782_s4, %s459_s29 }
  0x1b   : > { %v244_v2 = vld [vmem:[%s230_s10] sm:$0xf]  ;;  %249 = vperm.xlu0 %539, %v239_v1   ;;  %s363_s5 = sshll.u32 %s223_s30, 4  ;;  %s631_s18 = smov [#allocation2]   ;;  %s733_s5 = int_to_ptr.vmem [resolvable:$true] %s363_s5 }
  0x1c   : > { %245 = vrot.lane.b32.xlu1 %v244_v2, %s624_s11  ;;  %v261_v11 = vrot.slane %v244_v2, 4  ;;  %s543_s10 = scalar_lea.vmem %s733_s5, 128  ;;  %s547_s11 = sshll.u32 %s631_s18, 4  ;;  %s548_s11 = int_to_ptr.vmem [resolvable:$false] %s547_s11 }
  0x1d   : > { %p544_p12 = scmp.ne.s32.totalorder %s733_s5, %s543_s10  ;;  %p550_p1 = scmp.lt.s32.totalorder %s733_s5, %s548_s11 }
  0x1f   : > { %540 = vset.pattern.permute.xlu0 %v625_v3  ;;  %p545_p13 = pnand %p544_p12, %p697_p4 }
  0x20   : > { %253 = vrot.lane.b32.xlu1 %v244_v2, %s626_s12  ;;  %256 = vperm.xlu0 %540, %v239_v1   ;;  %s549_s12 = scalar_lea.vmem %s548_s11, 256 }
  0x21   : > { %p546_p0 = pneg %p545_p13  ;;  %p551_p2 = scmp.lt.s32.totalorder %s549_s12, %s543_s10 }
  0x23   : > { %p552_p3 = por %p551_p2, %p550_p1 }
  0x24   : > { %542 = vset.pattern.permute.xlu0 %v623_v0  ;;  %267 = vperm.xlu1 %541, %v236_v6  }
  0x25   : > { %p553_p5 = pnand %p552_p3, %p546_p0 }
  0x8e   : > { %v246_v9 = vpop.permute.xlu1 %245 }
  0x92   : > { %v254_v13 = vpop.permute.xlu1 %253 }
  0x9a   : > { %v250_v10 = vpop.permute.xlu0 %249 }
  0x9b   : > { %v252_v12 = vsel %vm242_vm1, %v250_v10, %v246_v9 }
  0x9c   : > { %v264_v16 = vsel %vm263_vm3, %v252_v12, %v261_v11 }
  0x9f   : > { %v257_v14 = vpop.permute.xlu0 %256 }
  0xa0   : > { %v259_v15 = vsel %vm243_vm2, %v257_v14, %v254_v13 }
  0xa1   : > { %v473_v17 = vpack.c.bf16 %v259_v15, %v264_v16 }
  0xa3   : > { %475 = vmatpush3.bf16.msk.msra.mxu0 %vm474_vm5, %v473_v17  ;;  %v268_v19 = vpop.permute.xlu1 %267 }
  0xa6   : > { %470 = vmatmul.mubr.msk.f32.vlgmr.msra.gmra.mrb[0].mxu0 %vm270_vm6, %v235_v18 }
 0x179   : > { %v343_v20 = vpop.f32.mrb[0].mxu0 }
 0x17a   : > { %v344_v21 = vadd.f32 %v343_v20, %v268_v19  ;;  %v471_v22 = vpop.f32.mrb[1].mxu0 }
 0x17c   : > { %347 = vst [vmem:[%s223_s30] sm:$0xff] %v344_v21 }
 0x17d   : > { %556 = shalt.err (!%p553_p5)
}
 0x17e   : > { %s557_s13 = scalar_lea.hbm %s731_s8, 128  ;;  %s561_s22 = scalar_lea.hbm %s782_s4, 256 }
 0x17f   : > { %p558_p6 = scmp.ne.s32.totalorder %s731_s8, %s557_s13  ;;  %p562_p10 = scmp.lt.u32.totalorder %s731_s8, %s782_s4 }
 0x180   : > { %p563_p11 = scmp.lt.u32.totalorder %s561_s22, %s557_s13  ;;  %p565_p13 = scmp.lt.u32.totalorder %s557_s13, %s731_s8 }
 0x181   : > { %p559_p7 = pnand %p558_p6, %p697_p4 }
 0x182   : > { %p564_p12 = por %p563_p11, %p562_p10 }
 0x183   : > { %p560_p9 = pneg %p559_p7 }
 0x184   : > { %p566_p0 = por %p565_p13, %p564_p12 }
 0x186   : > { %p567_p1 = pnand %p566_p0, %p560_p9 }
 0x188   : > { %570 = shalt.err (!%p567_p1)
}
 0x189   : > { %476 = dma.vmem_to_hbm [thread:$0]  (%p697_p4), %s733_s5, 128, %s731_s8, %s349_s9  }
 0x18a PF: > { %p482_p2 = scmp.ge.s32.totalorder %s621_s20, 2  ;;  %s375_s29 = sand.u32 1, %s601_s15  }
 0x18b   : > { %s376_s30 = scalar_lea.sflag [#allocation3], %s375_s29 }
 0x18c   : > { %p479_p3 = pnand %p482_p2, %p704_p8 }
 0x18e   : > { %596 = dma.done.wait (!%p479_p3), %s376_s30, 128  }
 0x18f   : > { %598 = vsyncadd (!%p479_p3), %s376_s30, 4294967168  ;;  %s17_s20 = sadd.s32 1, %s621_s20   ;;  %s785_s15 = smov %s605_s16 }
 0x190   : > { %p14_p5 = scmp.ge.s32.totalorder %s17_s20, 4   ;;  %s786_s16 = smov %s609_s17 }
 0x191   : > { %s787_s17 = smov %s710_s28  ;;  %s788_s18 = smov %s617_s19 }
 0x192   : > { %s789_s19 = smov %s791_s23  ;;  %16 = sbr.rel (!%p14_p5) target bundleno = 4 (0x4), region = 75 }
 0x199   :  { %381 = vsyncpa [#allocation3], 1 }
 0x19a   :  { %383 = vsyncpa [#allocation3 + $0x1], 1 }

</bundles_post_ra>
